<compile_context>
chip_gen: v5e
topology: v5e:2x2
jax: 0.10.0
libtpu: 0.0.40
codegen_flags: <defaults>
</compile_context>

<pallas_src>
import math
import functools

import jax
import jax.numpy as jnp
from jax import lax
from jax.experimental import pallas as pl
from jax.experimental.pallas import tpu as pltpu

_LANE = 128


def flowgan_kernel(wt_ref, b_ref, a_ref, cst_ref, x_ref, y_ref, lp_ref, *,
                   n, relog_every=8, unroll_threshold=32):
    """
    wt_ref : (4*(n+1),) SMEM -- W.T per layer, row-major [wt00, wt01, wt10, wt11]
    b_ref  : (2*(n+1),) SMEM -- linear biases
    a_ref  : (2*n,)     SMEM -- positive scales of the tanh layers
    cst_ref: (1,)       SMEM -- log(1/(2*pi)) + sum_i logdet(linear_i)
    x_ref  : (2, TR, 128) VMEM block  (feature planes of the batch tile)
    y_ref  : (2, TR, 128) VMEM block  (output)
    lp_ref : (TR, 128)    VMEM block  (output log-density)
    """

    def linear(i, p0, p1):
        # y = p @ W.T + b, expanded per feature plane as scalar*vreg FMAs.
        w = 4 * i
        q0 = p0 * wt_ref[w + 0] + p1 * wt_ref[w + 2] + b_ref[2 * i + 0]
        q1 = p0 * wt_ref[w + 1] + p1 * wt_ref[w + 3] + b_ref[2 * i + 1]
        return q0, q1

    def layer(i, y0, y1):
        # hyp[i]: y -> y + a*tanh(y), followed by lin[i+1].
        # Returns the per-sample Jacobian *factor* of the nonlinearity
        # (product over the 2 features); log taken by the caller.
        a0 = a_ref[2 * i + 0]
        a1 = a_ref[2 * i + 1]
        t0 = jnp.tanh(y0)
        t1 = jnp.tanh(y1)
        f = (1.0 + a0 * (1.0 - t0 * t0)) * (1.0 + a1 * (1.0 - t1 * t1))
        y0 = y0 + a0 * t0
        y1 = y1 + a1 * t1
        y0, y1 = linear(i + 1, y0, y1)
        return y0, y1, f

    x0 = x_ref[0]
    x1 = x_ref[1]

    # lin[0]
    y0, y1 = linear(0, x0, x1)
    lJ = jnp.zeros_like(y0)

    if n <= unroll_threshold:
        # Fully unrolled: scalar SMEM reads resolve at trace time.
        prod = None
        since = 0
        for i in range(n):
            y0, y1, f = layer(i, y0, y1)
            prod = f if prod is None else prod * f
            since += 1
            if since == relog_every:      # periodic re-log: keeps the product
                lJ = lJ + jnp.log(prod)   # away from f32 over/underflow
                prod = None
                since = 0
        if prod is not None:
            lJ = lJ + jnp.log(prod)
    else:
        # Deep flow: fori_loop over relog blocks, relog_every layers unrolled
        # per body; per-layer scalars read from SMEM with dynamic indices.
        n_blk = n // relog_every
        tail = n - n_blk * relog_every

        def blk_body(b, carry):
            y0, y1, lJ = carry
            base = b * relog_every
            prod = None
            for j in range(relog_every):
                y0, y1, f = layer(base + j, y0, y1)
                prod = f if prod is None else prod * f
            return (y0, y1, lJ + jnp.log(prod))

        y0, y1, lJ = lax.fori_loop(0, n_blk, blk_body, (y0, y1, lJ))

        if tail:
            prod = None
            for j in range(tail):
                y0, y1, f = layer(n_blk * relog_every + j, y0, y1)
                prod = f if prod is None else prod * f
            lJ = lJ + jnp.log(prod)

    y_ref[0] = y0.astype(y_ref.dtype)
    y_ref[1] = y1.astype(y_ref.dtype)
    lp = cst_ref[0] - 0.5 * (y0 * y0 + y1 * y1) + lJ
    lp_ref[...] = lp.astype(lp_ref.dtype)


def _choose_block_rows(batch, max_block_rows=512):
    """Largest multiple-of-8 row block <= max_block_rows that still leaves
    >= 2 grid steps where the batch allows it (keeps both v7x TensorCores
    busy while amortizing the ~0.35 us per-grid-step pipeline overhead)."""
    rows_needed = -(-batch // _LANE)
    half = max(8, (rows_needed // 2) // 8 * 8)
    return int(min(max_block_rows, half))


def flowgan_forward(x, wt_all, b_all, logdet_lin, a_hyp, *, n,
                    block_rows=None, relog_every=8, unroll_threshold=32,
                    interpret=False):
    """x: (B, 2).  Returns (y: (B, 2), logp: (B,))."""
    B, d = x.shape
    assert d == 2
    assert n >= 1

    if block_rows is None:
        block_rows = _choose_block_rows(B)

    rows_needed = -(-B // _LANE)
    num_blocks = -(-rows_needed // block_rows)
    rows = num_blocks * block_rows
    b_pad = rows * _LANE

    # Feature-major, fully dense planes: (2, rows, 128).
    # TODO(synk): keeping the data feature-major across calls at the API
    # boundary would remove this pad+transpose HBM pass (mem-bound at small n).
    xp = jnp.zeros((b_pad, 2), jnp.float32).at[:B].set(x.astype(jnp.float32))
    xp = xp.T.reshape(2, rows, _LANE)

    # 1-D SMEM parameter tables (2-D SMEM would pad to [ceil(R/8)*8, 128]).
    wt_flat = wt_all.astype(jnp.float32).reshape(4 * (n + 1))
    b_flat = b_all.astype(jnp.float32).reshape(2 * (n + 1))
    a_flat = a_hyp.astype(jnp.float32).reshape(2 * n)
    cst = (jnp.float32(math.log(1.0 / (2.0 * math.pi)))
           + jnp.sum(logdet_lin.astype(jnp.float32))).reshape(1)

    kernel = functools.partial(flowgan_kernel, n=n, relog_every=relog_every,
                               unroll_threshold=unroll_threshold)
    y_planes, lp_planes = pl.pallas_call(
        kernel,
        grid=(num_blocks,),
        out_shape=(
            jax.ShapeDtypeStruct((2, rows, _LANE), jnp.float32),
            jax.ShapeDtypeStruct((rows, _LANE), jnp.float32),
        ),
        in_specs=[
            pl.BlockSpec(memory_space=pltpu.MemorySpace.SMEM),   # wt_flat
            pl.BlockSpec(memory_space=pltpu.MemorySpace.SMEM),   # b_flat
            pl.BlockSpec(memory_space=pltpu.MemorySpace.SMEM),   # a_flat
            pl.BlockSpec(memory_space=pltpu.MemorySpace.SMEM),   # cst
            pl.BlockSpec((2, block_rows, _LANE), lambda i: (0, i, 0)),  # x
        ],
        out_specs=(
            pl.BlockSpec((2, block_rows, _LANE), lambda i: (0, i, 0)),  # y
            pl.BlockSpec((block_rows, _LANE), lambda i: (i, 0)),        # logp
        ),
        compiler_params=pltpu.CompilerParams(
            dimension_semantics=("parallel",),       # shard batch over TCs (v7x)
            # footprint at 512-row blocks is <6 MiB double-buffered; keep a
            # generous explicit limit rather than shrinking tiles.
            vmem_limit_bytes=48 * 1024 * 1024,
        ),
        interpret=interpret,
    )(wt_flat, b_flat, a_flat, cst, xp)

    # Back to the module's (B, 2) / (B,) views.
    y = y_planes.reshape(2, b_pad).T[:B]
    lp = lp_planes.reshape(b_pad)[:B]
    return y, lp


def make_params(key, n, d=2):
    """Deterministic parameter construction (stands in for nn.Module init)."""
    kL, kU, kD, kb, ka = jax.random.split(key, 5)
    # LU layers (n+1 of them)
    L_raw = jax.random.normal(kL, (n + 1, d, d), dtype=jnp.float32) * 0.1
    U_raw = jax.random.normal(kU, (n + 1, d, d), dtype=jnp.float32) * 0.1
    diag_u = jnp.exp(jax.random.normal(kD, (n + 1, d), dtype=jnp.float32) * 0.1)
    eye = jnp.eye(d, dtype=jnp.float32)
    L = L_raw * jnp.tril(jnp.ones((d, d), jnp.float32), k=-1) + eye
    U = U_raw * jnp.triu(jnp.ones((d, d), jnp.float32), k=1) + eye * diag_u[:, :, None]
    W = jnp.einsum("nij,njk->nik", L, U)                 # (n+1, d, d)
    WT = jnp.swapaxes(W, -1, -2)                         # pass W.T around
    b = jax.random.normal(kb, (n + 1, d), dtype=jnp.float32) * 0.1
    logdet_lin = jnp.sum(jnp.log(diag_u), axis=1)        # (n+1,)
    # nLayer scales (n of them), strictly positive
    a_hyp = jax.nn.softplus(jax.random.normal(ka, (n, d), dtype=jnp.float32))
    return WT, b, logdet_lin, a_hyp


def flowgan_ref(x, wt_all, b_all, logdet_lin, a_hyp, n):
    """Pure-JAX reference mirroring the PyTorch forward."""
    y = x @ wt_all[0] + b_all[0]
    lJ = jnp.full((x.shape[0],), logdet_lin[0], jnp.float32)
    for i in range(n):
        t = jnp.tanh(y)
        lJ = lJ + jnp.sum(jnp.log1p(a_hyp[i] * (1.0 - t * t)), axis=1)
        y = y + a_hyp[i] * t
        y = y @ wt_all[i + 1] + b_all[i + 1]
        lJ = lJ + logdet_lin[i + 1]
    lp = math.log(1.0 / (2.0 * math.pi)) - jnp.sum(y * y, axis=1) / 2.0 + lJ
    return y, lp


def _check(y, logp, y_ref, logp_ref, B):
    assert y.shape == (B, 2) and logp.shape == (B,)
    assert jnp.allclose(y, y_ref, atol=1e-4, rtol=1e-4)
    assert jnp.allclose(logp, logp_ref, atol=1e-4, rtol=1e-4)


if __name__ == "__main__":
    key = jax.random.PRNGKey(0)

    # ---- Test 1: default (fully unrolled) path -----------------------------
    n1, B1 = 4, 2500        # non-multiple of the tile -> exercises padding and
                            # a multi-step "parallel" batch grid
    kx1, kp1, key = jax.random.split(key, 3)
    x1 = jax.random.normal(kx1, (B1, 2), dtype=jnp.float32)
    wt1, b1, ld1, a1 = make_params(kp1, n1)
    y1, lp1 = flowgan_forward(x1, wt1, b1, ld1, a1, n=n1)
    y1 = jax.block_until_ready(y1)
    lp1 = jax.block_until_ready(lp1)
    y1_ref, lp1_ref = flowgan_ref(x1, wt1, b1, ld1, a1, n1)
    _check(y1, lp1, y1_ref, lp1_ref, B1)

    # ---- Test 2: force the fori_loop (deep-flow) path + relog tail ---------
    n2, B2 = 6, 700
    kx2, kp2, key = jax.random.split(key, 3)
    x2 = jax.random.normal(kx2, (B2, 2), dtype=jnp.float32)
    wt2, b2, ld2, a2 = make_params(kp2, n2)
    y2, lp2 = flowgan_forward(x2, wt2, b2, ld2, a2, n=n2,
                              relog_every=4, unroll_threshold=0)
    y2 = jax.block_until_ready(y2)
    lp2 = jax.block_until_ready(lp2)
    y2_ref, lp2_ref = flowgan_ref(x2, wt2, b2, ld2, a2, n2)
    _check(y2, lp2, y2_ref, lp2_ref, B2)

    print("KERNEL_OK")
</pallas_src>

<mosaic_0001>
module attributes {stable_mosaic.version = 11 : i64} {
  func.func @flowgan_kernel(%arg0: i32, %arg1: memref<20xf32, #tpu.memory_space<smem>>, %arg2: memref<10xf32, #tpu.memory_space<smem>>, %arg3: memref<8xf32, #tpu.memory_space<smem>>, %arg4: memref<1xf32, #tpu.memory_space<smem>>, %arg5: memref<2x8x128xf32, #tpu.memory_space<vmem>>, %arg6: memref<2x8x128xf32, #tpu.memory_space<vmem>>, %arg7: memref<8x128xf32, #tpu.memory_space<vmem>>) attributes {dimension_semantics = [#tpu.dimension_semantics<parallel>], iteration_bounds = array<i64: 3>, scalar_prefetch = 0 : i64, scratch_operands = 0 : i64, tpu.core_type = #tpu.core_type<tc>, window_params = [{transform_indices = @transform_0, window_bounds = array<i64: 20>}, {transform_indices = @transform_1, window_bounds = array<i64: 10>}, {transform_indices = @transform_2, window_bounds = array<i64: 8>}, {transform_indices = @transform_3, window_bounds = array<i64: 1>}, {transform_indices = @transform_4, window_bounds = array<i64: 2, 8, 128>}, {transform_indices = @transform_5, window_bounds = array<i64: 2, 8, 128>}, {transform_indices = @transform_6, window_bounds = array<i64: 8, 128>}]} {
    %c0 = arith.constant 0 : index
    %c0_0 = arith.constant 0 : index
    %c0_1 = arith.constant 0 : index
    %0 = vector.load %arg5[%c0, %c0_0, %c0_1] : memref<2x8x128xf32, #tpu.memory_space<vmem>>, vector<1x8x128xf32>
    %1 = vector.shape_cast %0 : vector<1x8x128xf32> to vector<8x128xf32>
    %c1 = arith.constant 1 : index
    %c0_2 = arith.constant 0 : index
    %c0_3 = arith.constant 0 : index
    %2 = vector.load %arg5[%c1, %c0_2, %c0_3] : memref<2x8x128xf32, #tpu.memory_space<vmem>>, vector<1x8x128xf32>
    %3 = vector.shape_cast %2 : vector<1x8x128xf32> to vector<8x128xf32>
    %c0_4 = arith.constant 0 : index
    %4 = memref.load %arg1[%c0_4] : memref<20xf32, #tpu.memory_space<smem>>
    %5 = vector.broadcast %4 : f32 to vector<8x128xf32>
    %6 = arith.mulf %1, %5 : vector<8x128xf32>
    %c2 = arith.constant 2 : index
    %7 = memref.load %arg1[%c2] : memref<20xf32, #tpu.memory_space<smem>>
    %8 = vector.broadcast %7 : f32 to vector<8x128xf32>
    %9 = arith.mulf %3, %8 : vector<8x128xf32>
    %10 = arith.addf %6, %9 : vector<8x128xf32>
    %c0_5 = arith.constant 0 : index
    %11 = memref.load %arg2[%c0_5] : memref<10xf32, #tpu.memory_space<smem>>
    %12 = vector.broadcast %11 : f32 to vector<8x128xf32>
    %13 = arith.addf %10, %12 : vector<8x128xf32>
    %c1_6 = arith.constant 1 : index
    %14 = memref.load %arg1[%c1_6] : memref<20xf32, #tpu.memory_space<smem>>
    %15 = vector.broadcast %14 : f32 to vector<8x128xf32>
    %16 = arith.mulf %1, %15 : vector<8x128xf32>
    %c3 = arith.constant 3 : index
    %17 = memref.load %arg1[%c3] : memref<20xf32, #tpu.memory_space<smem>>
    %18 = vector.broadcast %17 : f32 to vector<8x128xf32>
    %19 = arith.mulf %3, %18 : vector<8x128xf32>
    %20 = arith.addf %16, %19 : vector<8x128xf32>
    %c1_7 = arith.constant 1 : index
    %21 = memref.load %arg2[%c1_7] : memref<10xf32, #tpu.memory_space<smem>>
    %22 = vector.broadcast %21 : f32 to vector<8x128xf32>
    %23 = arith.addf %20, %22 : vector<8x128xf32>
    %cst = arith.constant 0.000000e+00 : f32
    %24 = vector.broadcast %cst : f32 to vector<8x128xf32>
    %c0_8 = arith.constant 0 : index
    %25 = memref.load %arg3[%c0_8] : memref<8xf32, #tpu.memory_space<smem>>
    %c1_9 = arith.constant 1 : index
    %26 = memref.load %arg3[%c1_9] : memref<8xf32, #tpu.memory_space<smem>>
    %27 = math.tanh %13 : vector<8x128xf32>
    %28 = math.tanh %23 : vector<8x128xf32>
    %29 = arith.mulf %27, %27 : vector<8x128xf32>
    %cst_10 = arith.constant 1.000000e+00 : f32
    %30 = vector.broadcast %cst_10 : f32 to vector<8x128xf32>
    %31 = arith.subf %30, %29 : vector<8x128xf32>
    %32 = vector.broadcast %25 : f32 to vector<8x128xf32>
    %33 = arith.mulf %32, %31 : vector<8x128xf32>
    %cst_11 = arith.constant 1.000000e+00 : f32
    %34 = vector.broadcast %cst_11 : f32 to vector<8x128xf32>
    %35 = arith.addf %34, %33 : vector<8x128xf32>
    %36 = arith.mulf %28, %28 : vector<8x128xf32>
    %cst_12 = arith.constant 1.000000e+00 : f32
    %37 = vector.broadcast %cst_12 : f32 to vector<8x128xf32>
    %38 = arith.subf %37, %36 : vector<8x128xf32>
    %39 = vector.broadcast %26 : f32 to vector<8x128xf32>
    %40 = arith.mulf %39, %38 : vector<8x128xf32>
    %cst_13 = arith.constant 1.000000e+00 : f32
    %41 = vector.broadcast %cst_13 : f32 to vector<8x128xf32>
    %42 = arith.addf %41, %40 : vector<8x128xf32>
    %43 = arith.mulf %35, %42 : vector<8x128xf32>
    %44 = vector.broadcast %25 : f32 to vector<8x128xf32>
    %45 = arith.mulf %44, %27 : vector<8x128xf32>
    %46 = arith.addf %13, %45 : vector<8x128xf32>
    %47 = vector.broadcast %26 : f32 to vector<8x128xf32>
    %48 = arith.mulf %47, %28 : vector<8x128xf32>
    %49 = arith.addf %23, %48 : vector<8x128xf32>
    %c4 = arith.constant 4 : index
    %50 = memref.load %arg1[%c4] : memref<20xf32, #tpu.memory_space<smem>>
    %51 = vector.broadcast %50 : f32 to vector<8x128xf32>
    %52 = arith.mulf %46, %51 : vector<8x128xf32>
    %c6 = arith.constant 6 : index
    %53 = memref.load %arg1[%c6] : memref<20xf32, #tpu.memory_space<smem>>
    %54 = vector.broadcast %53 : f32 to vector<8x128xf32>
    %55 = arith.mulf %49, %54 : vector<8x128xf32>
    %56 = arith.addf %52, %55 : vector<8x128xf32>
    %c2_14 = arith.constant 2 : index
    %57 = memref.load %arg2[%c2_14] : memref<10xf32, #tpu.memory_space<smem>>
    %58 = vector.broadcast %57 : f32 to vector<8x128xf32>
    %59 = arith.addf %56, %58 : vector<8x128xf32>
    %c5 = arith.constant 5 : index
    %60 = memref.load %arg1[%c5] : memref<20xf32, #tpu.memory_space<smem>>
    %61 = vector.broadcast %60 : f32 to vector<8x128xf32>
    %62 = arith.mulf %46, %61 : vector<8x128xf32>
    %c7 = arith.constant 7 : index
    %63 = memref.load %arg1[%c7] : memref<20xf32, #tpu.memory_space<smem>>
    %64 = vector.broadcast %63 : f32 to vector<8x128xf32>
    %65 = arith.mulf %49, %64 : vector<8x128xf32>
    %66 = arith.addf %62, %65 : vector<8x128xf32>
    %c3_15 = arith.constant 3 : index
    %67 = memref.load %arg2[%c3_15] : memref<10xf32, #tpu.memory_space<smem>>
    %68 = vector.broadcast %67 : f32 to vector<8x128xf32>
    %69 = arith.addf %66, %68 : vector<8x128xf32>
    %c2_16 = arith.constant 2 : index
    %70 = memref.load %arg3[%c2_16] : memref<8xf32, #tpu.memory_space<smem>>
    %c3_17 = arith.constant 3 : index
    %71 = memref.load %arg3[%c3_17] : memref<8xf32, #tpu.memory_space<smem>>
    %72 = math.tanh %59 : vector<8x128xf32>
    %73 = math.tanh %69 : vector<8x128xf32>
    %74 = arith.mulf %72, %72 : vector<8x128xf32>
    %cst_18 = arith.constant 1.000000e+00 : f32
    %75 = vector.broadcast %cst_18 : f32 to vector<8x128xf32>
    %76 = arith.subf %75, %74 : vector<8x128xf32>
    %77 = vector.broadcast %70 : f32 to vector<8x128xf32>
    %78 = arith.mulf %77, %76 : vector<8x128xf32>
    %cst_19 = arith.constant 1.000000e+00 : f32
    %79 = vector.broadcast %cst_19 : f32 to vector<8x128xf32>
    %80 = arith.addf %79, %78 : vector<8x128xf32>
    %81 = arith.mulf %73, %73 : vector<8x128xf32>
    %cst_20 = arith.constant 1.000000e+00 : f32
    %82 = vector.broadcast %cst_20 : f32 to vector<8x128xf32>
    %83 = arith.subf %82, %81 : vector<8x128xf32>
    %84 = vector.broadcast %71 : f32 to vector<8x128xf32>
    %85 = arith.mulf %84, %83 : vector<8x128xf32>
    %cst_21 = arith.constant 1.000000e+00 : f32
    %86 = vector.broadcast %cst_21 : f32 to vector<8x128xf32>
    %87 = arith.addf %86, %85 : vector<8x128xf32>
    %88 = arith.mulf %80, %87 : vector<8x128xf32>
    %89 = vector.broadcast %70 : f32 to vector<8x128xf32>
    %90 = arith.mulf %89, %72 : vector<8x128xf32>
    %91 = arith.addf %59, %90 : vector<8x128xf32>
    %92 = vector.broadcast %71 : f32 to vector<8x128xf32>
    %93 = arith.mulf %92, %73 : vector<8x128xf32>
    %94 = arith.addf %69, %93 : vector<8x128xf32>
    %c8 = arith.constant 8 : index
    %95 = memref.load %arg1[%c8] : memref<20xf32, #tpu.memory_space<smem>>
    %96 = vector.broadcast %95 : f32 to vector<8x128xf32>
    %97 = arith.mulf %91, %96 : vector<8x128xf32>
    %c10 = arith.constant 10 : index
    %98 = memref.load %arg1[%c10] : memref<20xf32, #tpu.memory_space<smem>>
    %99 = vector.broadcast %98 : f32 to vector<8x128xf32>
    %100 = arith.mulf %94, %99 : vector<8x128xf32>
    %101 = arith.addf %97, %100 : vector<8x128xf32>
    %c4_22 = arith.constant 4 : index
    %102 = memref.load %arg2[%c4_22] : memref<10xf32, #tpu.memory_space<smem>>
    %103 = vector.broadcast %102 : f32 to vector<8x128xf32>
    %104 = arith.addf %101, %103 : vector<8x128xf32>
    %c9 = arith.constant 9 : index
    %105 = memref.load %arg1[%c9] : memref<20xf32, #tpu.memory_space<smem>>
    %106 = vector.broadcast %105 : f32 to vector<8x128xf32>
    %107 = arith.mulf %91, %106 : vector<8x128xf32>
    %c11 = arith.constant 11 : index
    %108 = memref.load %arg1[%c11] : memref<20xf32, #tpu.memory_space<smem>>
    %109 = vector.broadcast %108 : f32 to vector<8x128xf32>
    %110 = arith.mulf %94, %109 : vector<8x128xf32>
    %111 = arith.addf %107, %110 : vector<8x128xf32>
    %c5_23 = arith.constant 5 : index
    %112 = memref.load %arg2[%c5_23] : memref<10xf32, #tpu.memory_space<smem>>
    %113 = vector.broadcast %112 : f32 to vector<8x128xf32>
    %114 = arith.addf %111, %113 : vector<8x128xf32>
    %115 = arith.mulf %43, %88 : vector<8x128xf32>
    %c4_24 = arith.constant 4 : index
    %116 = memref.load %arg3[%c4_24] : memref<8xf32, #tpu.memory_space<smem>>
    %c5_25 = arith.constant 5 : index
    %117 = memref.load %arg3[%c5_25] : memref<8xf32, #tpu.memory_space<smem>>
    %118 = math.tanh %104 : vector<8x128xf32>
    %119 = math.tanh %114 : vector<8x128xf32>
    %120 = arith.mulf %118, %118 : vector<8x128xf32>
    %cst_26 = arith.constant 1.000000e+00 : f32
    %121 = vector.broadcast %cst_26 : f32 to vector<8x128xf32>
    %122 = arith.subf %121, %120 : vector<8x128xf32>
    %123 = vector.broadcast %116 : f32 to vector<8x128xf32>
    %124 = arith.mulf %123, %122 : vector<8x128xf32>
    %cst_27 = arith.constant 1.000000e+00 : f32
    %125 = vector.broadcast %cst_27 : f32 to vector<8x128xf32>
    %126 = arith.addf %125, %124 : vector<8x128xf32>
    %127 = arith.mulf %119, %119 : vector<8x128xf32>
    %cst_28 = arith.constant 1.000000e+00 : f32
    %128 = vector.broadcast %cst_28 : f32 to vector<8x128xf32>
    %129 = arith.subf %128, %127 : vector<8x128xf32>
    %130 = vector.broadcast %117 : f32 to vector<8x128xf32>
    %131 = arith.mulf %130, %129 : vector<8x128xf32>
    %cst_29 = arith.constant 1.000000e+00 : f32
    %132 = vector.broadcast %cst_29 : f32 to vector<8x128xf32>
    %133 = arith.addf %132, %131 : vector<8x128xf32>
    %134 = arith.mulf %126, %133 : vector<8x128xf32>
    %135 = vector.broadcast %116 : f32 to vector<8x128xf32>
    %136 = arith.mulf %135, %118 : vector<8x128xf32>
    %137 = arith.addf %104, %136 : vector<8x128xf32>
    %138 = vector.broadcast %117 : f32 to vector<8x128xf32>
    %139 = arith.mulf %138, %119 : vector<8x128xf32>
    %140 = arith.addf %114, %139 : vector<8x128xf32>
    %c12 = arith.constant 12 : index
    %141 = memref.load %arg1[%c12] : memref<20xf32, #tpu.memory_space<smem>>
    %142 = vector.broadcast %141 : f32 to vector<8x128xf32>
    %143 = arith.mulf %137, %142 : vector<8x128xf32>
    %c14 = arith.constant 14 : index
    %144 = memref.load %arg1[%c14] : memref<20xf32, #tpu.memory_space<smem>>
    %145 = vector.broadcast %144 : f32 to vector<8x128xf32>
    %146 = arith.mulf %140, %145 : vector<8x128xf32>
    %147 = arith.addf %143, %146 : vector<8x128xf32>
    %c6_30 = arith.constant 6 : index
    %148 = memref.load %arg2[%c6_30] : memref<10xf32, #tpu.memory_space<smem>>
    %149 = vector.broadcast %148 : f32 to vector<8x128xf32>
    %150 = arith.addf %147, %149 : vector<8x128xf32>
    %c13 = arith.constant 13 : index
    %151 = memref.load %arg1[%c13] : memref<20xf32, #tpu.memory_space<smem>>
    %152 = vector.broadcast %151 : f32 to vector<8x128xf32>
    %153 = arith.mulf %137, %152 : vector<8x128xf32>
    %c15 = arith.constant 15 : index
    %154 = memref.load %arg1[%c15] : memref<20xf32, #tpu.memory_space<smem>>
    %155 = vector.broadcast %154 : f32 to vector<8x128xf32>
    %156 = arith.mulf %140, %155 : vector<8x128xf32>
    %157 = arith.addf %153, %156 : vector<8x128xf32>
    %c7_31 = arith.constant 7 : index
    %158 = memref.load %arg2[%c7_31] : memref<10xf32, #tpu.memory_space<smem>>
    %159 = vector.broadcast %158 : f32 to vector<8x128xf32>
    %160 = arith.addf %157, %159 : vector<8x128xf32>
    %161 = arith.mulf %115, %134 : vector<8x128xf32>
    %c6_32 = arith.constant 6 : index
    %162 = memref.load %arg3[%c6_32] : memref<8xf32, #tpu.memory_space<smem>>
    %c7_33 = arith.constant 7 : index
    %163 = memref.load %arg3[%c7_33] : memref<8xf32, #tpu.memory_space<smem>>
    %164 = math.tanh %150 : vector<8x128xf32>
    %165 = math.tanh %160 : vector<8x128xf32>
    %166 = arith.mulf %164, %164 : vector<8x128xf32>
    %cst_34 = arith.constant 1.000000e+00 : f32
    %167 = vector.broadcast %cst_34 : f32 to vector<8x128xf32>
    %168 = arith.subf %167, %166 : vector<8x128xf32>
    %169 = vector.broadcast %162 : f32 to vector<8x128xf32>
    %170 = arith.mulf %169, %168 : vector<8x128xf32>
    %cst_35 = arith.constant 1.000000e+00 : f32
    %171 = vector.broadcast %cst_35 : f32 to vector<8x128xf32>
    %172 = arith.addf %171, %170 : vector<8x128xf32>
    %173 = arith.mulf %165, %165 : vector<8x128xf32>
    %cst_36 = arith.constant 1.000000e+00 : f32
    %174 = vector.broadcast %cst_36 : f32 to vector<8x128xf32>
    %175 = arith.subf %174, %173 : vector<8x128xf32>
    %176 = vector.broadcast %163 : f32 to vector<8x128xf32>
    %177 = arith.mulf %176, %175 : vector<8x128xf32>
    %cst_37 = arith.constant 1.000000e+00 : f32
    %178 = vector.broadcast %cst_37 : f32 to vector<8x128xf32>
    %179 = arith.addf %178, %177 : vector<8x128xf32>
    %180 = arith.mulf %172, %179 : vector<8x128xf32>
    %181 = vector.broadcast %162 : f32 to vector<8x128xf32>
    %182 = arith.mulf %181, %164 : vector<8x128xf32>
    %183 = arith.addf %150, %182 : vector<8x128xf32>
    %184 = vector.broadcast %163 : f32 to vector<8x128xf32>
    %185 = arith.mulf %184, %165 : vector<8x128xf32>
    %186 = arith.addf %160, %185 : vector<8x128xf32>
    %c16 = arith.constant 16 : index
    %187 = memref.load %arg1[%c16] : memref<20xf32, #tpu.memory_space<smem>>
    %188 = vector.broadcast %187 : f32 to vector<8x128xf32>
    %189 = arith.mulf %183, %188 : vector<8x128xf32>
    %c18 = arith.constant 18 : index
    %190 = memref.load %arg1[%c18] : memref<20xf32, #tpu.memory_space<smem>>
    %191 = vector.broadcast %190 : f32 to vector<8x128xf32>
    %192 = arith.mulf %186, %191 : vector<8x128xf32>
    %193 = arith.addf %189, %192 : vector<8x128xf32>
    %c8_38 = arith.constant 8 : index
    %194 = memref.load %arg2[%c8_38] : memref<10xf32, #tpu.memory_space<smem>>
    %195 = vector.broadcast %194 : f32 to vector<8x128xf32>
    %196 = arith.addf %193, %195 : vector<8x128xf32>
    %c17 = arith.constant 17 : index
    %197 = memref.load %arg1[%c17] : memref<20xf32, #tpu.memory_space<smem>>
    %198 = vector.broadcast %197 : f32 to vector<8x128xf32>
    %199 = arith.mulf %183, %198 : vector<8x128xf32>
    %c19 = arith.constant 19 : index
    %200 = memref.load %arg1[%c19] : memref<20xf32, #tpu.memory_space<smem>>
    %201 = vector.broadcast %200 : f32 to vector<8x128xf32>
    %202 = arith.mulf %186, %201 : vector<8x128xf32>
    %203 = arith.addf %199, %202 : vector<8x128xf32>
    %c9_39 = arith.constant 9 : index
    %204 = memref.load %arg2[%c9_39] : memref<10xf32, #tpu.memory_space<smem>>
    %205 = vector.broadcast %204 : f32 to vector<8x128xf32>
    %206 = arith.addf %203, %205 : vector<8x128xf32>
    %207 = arith.mulf %161, %180 : vector<8x128xf32>
    %208 = math.log %207 : vector<8x128xf32>
    %209 = arith.addf %24, %208 : vector<8x128xf32>
    %c0_40 = arith.constant 0 : index
    %c0_41 = arith.constant 0 : index
    %c0_42 = arith.constant 0 : index
    %210 = vector.load %arg6[%c0_40, %c0_41, %c0_42] : memref<2x8x128xf32, #tpu.memory_space<vmem>>, vector<1x8x128xf32>
    %211 = vector.shape_cast %210 : vector<1x8x128xf32> to vector<8x128xf32>
    %212 = vector.shape_cast %196 : vector<8x128xf32> to vector<1x8x128xf32>
    tpu.vector_store %arg6[%c0_40, %c0_41, %c0_42], %212 {strides = array<i32>} : memref<2x8x128xf32, #tpu.memory_space<vmem>>, vector<1x8x128xf32>,
    %c1_43 = arith.constant 1 : index
    %c0_44 = arith.constant 0 : index
    %c0_45 = arith.constant 0 : index
    %213 = vector.load %arg6[%c1_43, %c0_44, %c0_45] : memref<2x8x128xf32, #tpu.memory_space<vmem>>, vector<1x8x128xf32>
    %214 = vector.shape_cast %213 : vector<1x8x128xf32> to vector<8x128xf32>
    %215 = vector.shape_cast %206 : vector<8x128xf32> to vector<1x8x128xf32>
    tpu.vector_store %arg6[%c1_43, %c0_44, %c0_45], %215 {strides = array<i32>} : memref<2x8x128xf32, #tpu.memory_space<vmem>>, vector<1x8x128xf32>,
    %c0_46 = arith.constant 0 : index
    %216 = memref.load %arg4[%c0_46] : memref<1xf32, #tpu.memory_space<smem>>
    %217 = arith.mulf %196, %196 : vector<8x128xf32>
    %218 = arith.mulf %206, %206 : vector<8x128xf32>
    %219 = arith.addf %217, %218 : vector<8x128xf32>
    %cst_47 = arith.constant 5.000000e-01 : f32
    %220 = vector.broadcast %cst_47 : f32 to vector<8x128xf32>
    %221 = arith.mulf %220, %219 : vector<8x128xf32>
    %222 = vector.broadcast %216 : f32 to vector<8x128xf32>
    %223 = arith.subf %222, %221 : vector<8x128xf32>
    %224 = arith.addf %223, %209 : vector<8x128xf32>
    %c0_48 = arith.constant 0 : index
    %c0_49 = arith.constant 0 : index
    %225 = vector.load %arg7[%c0_48, %c0_49] : memref<8x128xf32, #tpu.memory_space<vmem>>, vector<8x128xf32>
    tpu.vector_store %arg7[%c0_48, %c0_49], %224 {strides = array<i32>} : memref<8x128xf32, #tpu.memory_space<vmem>>, vector<8x128xf32>,
    return
  }
  func.func @transform_0(%arg0: i32) -> i32 {
    %c0_i32 = arith.constant 0 : i32
    %c0_i32_0 = arith.constant 0 : i32
    return %c0_i32 : i32
  }
  func.func @transform_1(%arg0: i32) -> i32 {
    %c0_i32 = arith.constant 0 : i32
    %c0_i32_0 = arith.constant 0 : i32
    return %c0_i32 : i32
  }
  func.func @transform_2(%arg0: i32) -> i32 {
    %c0_i32 = arith.constant 0 : i32
    %c0_i32_0 = arith.constant 0 : i32
    return %c0_i32 : i32
  }
  func.func @transform_3(%arg0: i32) -> i32 {
    %c0_i32 = arith.constant 0 : i32
    %c0_i32_0 = arith.constant 0 : i32
    return %c0_i32 : i32
  }
  func.func @transform_4(%arg0: i32) -> (i32, i32, i32) {
    %c0_i32 = arith.constant 0 : i32
    %c0_i32_0 = arith.constant 0 : i32
    %c0_i32_1 = arith.constant 0 : i32
    return %c0_i32, %arg0, %c0_i32_0 : i32, i32, i32
  }
  func.func @transform_5(%arg0: i32) -> (i32, i32, i32) {
    %c0_i32 = arith.constant 0 : i32
    %c0_i32_0 = arith.constant 0 : i32
    %c0_i32_1 = arith.constant 0 : i32
    return %c0_i32, %arg0, %c0_i32_0 : i32, i32, i32
  }
  func.func @transform_6(%arg0: i32) -> (i32, i32) {
    %c0_i32 = arith.constant 0 : i32
    %c0_i32_0 = arith.constant 0 : i32
    return %arg0, %c0_i32 : i32, i32
  }
}

</mosaic_0001>

<bundles_post_ra>
// kernel: tpu_custom_call.1
= control target key start
LH: loop header
LB: loop body
LE: loop exit
PB: predicated region body
PF: predicated region fallthrough
CT: control target
= control target key end

     0   :  { %s1341_s0 = inlined_call_operand.vmem [shape: f32[20], index: 0, kind: input, shape index: {}]   ;;  %s1342_s1 = inlined_call_operand.vmem [shape: f32[10], index: 1, kind: input, shape index: {}]   ;;  %s1343_s2 = inlined_call_operand.vmem [shape: f32[8], index: 2, kind: input, shape index: {}]   ;;  %s1344_s3 = inlined_call_operand.<no memory space> [shape: f32[1], index: 3, kind: input, shape index: {}]   ;;  %s1345_s4 = inlined_call_operand.hbm [shape: f32[2,24,128], index: 4, kind: input, shape index: {}]   ;;  %s1346_s5 = inlined_call_operand.hbm [shape: f32[2,24,128], index: 5, kind: output, shape index: {0}]   ;;  %s1347_s6 = inlined_call_operand.hbm [shape: f32[24,128], index: 6, kind: output, shape index: {1}]  }
   0x1   :  { %1348 = sst [smem:[#allocation20_spill]] %s1341_s0 }
   0x2   :  { %1349 = sst [smem:[#allocation21_spill]] %s1342_s1 }
   0x3   :  { %12 = sst [smem:[#allocation2]] %s1344_s3 }
   0x4   :  { %13 = vsyncpa [#allocation6], 0 }
   0x5   :  { %14 = vsyncpa [#allocation8], 0 }
   0x6   :  { %15 = vsyncpa [#allocation4], 0 }
   0x7   :  { %17 = vsyncpa [#allocation4 + $0x1], 0 }
   0x8   :  { %18 = vsyncpa [#allocation5], 0 }
   0x9   :  { %20 = vsyncpa [#allocation5 + $0x1], 0 }
   0xa   :  { %21 = vsyncpa [#allocation13], 0 }
   0xb   :  { %23 = vsyncpa [#allocation13 + $0x1], 0  ;;  %s1084_s23 = smov 0   ;;  %s1086_s24 = smov 0  }
   0xc   :  { %s1088_s25 = smov 0   ;;  %s1090_s26 = smov 0  }
   0xd LB: > { %s1105_s3 = sadd.s32 4294967295, %s1035_s26   ;;  %s690_s27 = sadd.s32 4294967294, %s1035_s26   ;;  %s1035_s26 = sphi %s1090_s26, %s1363_s26   ;;  %s1031_s25 = sphi %s1088_s25, %s1362_s25   ;;  %s1027_s24 = sphi %s1086_s24, %s1361_s24   ;;  %s1023_s23 = sphi %s1084_s23, %s1360_s23  }
   0xe   : > { %s1109_s28 = sadd.s32 1, %s1035_s26   ;;  %s120_s29 = sadd.s32 1, %s1031_s25 }
   0xf   : > { %s117_s30 = ssub.s32 %s1035_s26, %s1109_s28  ;;  %p127_p0 = scmp.ne.s32.totalorder %s1031_s25, %s1027_s24 }
  0x10   : > { %p118_p1 = scmp.eq.s32.totalorder %s117_s30, 0  ;;  %p128_p2 = scmp.eq.s32.totalorder %s1035_s26, 0 }
  0x11   : > { %p133_p3 = scmp.ne.s32.totalorder %s1027_s24, %s1023_s23  ;;  %p134_p4 = scmp.eq.s32.totalorder %s1105_s3, 0 }
  0x12   : > { %s1121_s7 = scalar_select %p118_p1, %s1031_s25, %s120_s29  }
  0x13   : > { %p1123_p5 = por %p128_p2, %p127_p0  ;;  %p1129_p6 = por %p134_p4, %p133_p3 }
  0x14   : > { %1350 = sst [smem:[#allocation19_spill]] %s1121_s7  ;;  %p157_p7 = scmp.eq.s32.totalorder %s1105_s3, 2 }
  0x15   : > { %p163_p8 = scmp.eq.s32.totalorder %s690_s27, 2  ;;  %p691_p9 = scmp.ge.s32.totalorder %s1035_s26, 1 }
  0x16   : > { %p196_p10 = scmp.lt.s32.totalorder %s1035_s26, 4  ;;  %p1136_p11 = por %p157_p7, %p127_p0 }
  0x17   : > { %p1140_p12 = por %p163_p8, %p133_p3  ;;  %s1356_s1 = sld [smem:[#allocation21_spill]] }
  0x18   : > { %p1144_p13 = pnand %p691_p9, %p196_p10  ;;  %p790_p0 = scmp.lt.s32.totalorder %s1035_s26, 3 }
  0x19   : > { %s1357_s0 = sld [smem:[#allocation20_spill]]  ;;  %s1037_s20 = smov [#allocation7]  }
  0x1a   : > { %p766_p1 = pneg %p1144_p13  ;;  %p1161_p3 = pnand %p790_p0, %p1123_p5 }
  0x1b   : > { %s228_s27 = sshll.u32 %s1343_s2, 4  ;;  %s1038_s29 = smov [#allocation3]   ;;  %s229_s27 = int_to_ptr.vmem [resolvable:$true] %s228_s27 }
  0x1c   : > { %p767_p2 = pnand %p766_p1, %p134_p4  ;;  %s1039_s30 = smov [#allocation9]  }
  0x1d   : > { %s218_s15 = sshll.u32 %s1356_s1, 4  ;;  %s242_s13 = sand.u32 1, %s1031_s25   ;;  %s219_s15 = int_to_ptr.vmem [resolvable:$true] %s218_s15 }
  0x1e   : > { %772 = dma.vmem_to_smem (!%p767_p2), %s219_s15, 16, %s1037_s20, [#allocation8]  }
  0x1f   : > { %s208_s18 = sshll.u32 %s1357_s0, 4  ;;  %s697_s14 = sshll.u32 %s1035_s26, 3  ;;  %s209_s18 = int_to_ptr.vmem [resolvable:$true] %s208_s18 }
  0x20   : > { %769 = dma.vmem_to_smem (!%p767_p2), %s209_s18, 16, %s1038_s29, [#allocation6]  }
  0x21   : > { %775 = dma.vmem_to_smem (!%p767_p2), %s229_s27, 16, %s1039_s30, [#allocation8]  }
  0x22   : > { %s696_s8 = sshll.u32 %s242_s13, 4  ;;  %s250_s0 = scalar_lea.hbm %s1345_s4, %s697_s14 }
  0x23   : > { %s251_s1 = sshll.u32 %s250_s0, 4  ;;  %s246_s7 = scalar_lea.vmem [#allocation10], %s696_s8  ;;  %s252_s1 = int_to_ptr.hbm [resolvable:$true] %s251_s1 }
  0x24   : > { %s253_s15 = sshll.u32 %s246_s7, 4  ;;  %s243_s20 = scalar_lea.sflag [#allocation4], %s242_s13  ;;  %s254_s15 = int_to_ptr.vmem [resolvable:$true] %s253_s15 }
  0x25   : > { %s899_s21 = sshra.s32 %s252_s1, 4  ;;  %p903_p7 = pneg %p1161_p3  ;;  %s900_s21 = int_to_ptr.hbm [resolvable:$true] %s899_s21 }
  0x26   : > { %s901_s18 = scalar_lea.hbm %s900_s21, 16  ;;  %s906_s29 = scalar_lea.hbm %s1345_s4, 48 }
  0x27   : > { %p902_p5 = scmp.ne.s32.totalorder %s900_s21, %s901_s18  ;;  %p907_p10 = scmp.lt.s32.totalorder %s900_s21, %s1345_s4 }
  0x28   : > { %p908_p1 = scmp.lt.s32.totalorder %s906_s29, %s901_s18 }
  0x29   : > { %p904_p8 = pnand %p903_p7, %p902_p5 }
  0x2a   : > { %p909_p0 = por %p908_p1, %p907_p10 }
  0x2b   : > { %p905_p9 = pneg %p904_p8 }
  0x2d   : > { %p910_p2 = pnand %p909_p0, %p905_p9 }
  0x2f   : > { %913 = shalt.err (!%p910_p2)
}
  0x30   : > { %s1040_s0 = smov 384   ;;  %s1041_s7 = smov 128  }
  0x31   : > { %s1042_s13 = smov 8   ;;  %265 = sbr.rel (%p1144_p13) target bundleno = 172 (0xac), region = 40 }
  0x32   : > { %779 = dma.hbm_to_vmem [thread:$0]  (!%p1161_p3), %s252_s1, 256, %s254_s15, %s243_s20, %s1040_s0, %s1041_s7, %s1042_s13  }
  0x36   : > { %1002 = dma.done.wait (%p134_p4), [#allocation6], 16  }
  0x37   : > { %1004 = vsyncadd (%p134_p4), [#allocation6], 4294967280 }
  0x38   : > { %1006 = dma.done.wait (%p134_p4), [#allocation8], 32  }
  0x39   : > { %1008 = vsyncadd (%p134_p4), [#allocation8], 4294967264  ;;  %s1194_s8 = sand.u32 1, %s1027_s24  }
  0x3a   : > { %s702_s1 = sshll.u32 %s1194_s8, 4  ;;  %s283_s12 = scalar_lea.sflag [#allocation4], %s1194_s8 }
  0x3b   : > { %s286_s19 = scalar_lea.vmem [#allocation10], %s702_s1 }
  0x3c   : > { %1010 = dma.done.wait (%p1129_p6), %s283_s12, 256  }
  0x3d   : > { %1012 = vsyncadd (%p1129_p6), %s283_s12, 4294967040 }
  0x3e   : > { %292 = sfence }
  0x3f   : > { %s325_s16 = sld [smem:[#allocation3]]  ;;  %v322_v0 = vld [vmem:[%s286_s19] sm:$0xff]  ;;  %v705_v1 = vld [vmem:[%s286_s19 + $0x8] sm:$0xff] }
  0x40   : > { %s706_s17 = sld [smem:[#allocation3 + $0x2]] }
  0x41   : > { %s332_s15 = sld [smem:[#allocation7]] }
  0x42   : > { %s707_s20 = sld [smem:[#allocation3 + $0x1]] }
  0x43   : > { %s708_s21 = sld [smem:[#allocation3 + $0x3]] }
  0x44   : > { %s709_s18 = sld [smem:[#allocation7 + $0x1]] }
  0x45   : > { %v326_v2 = vstv %s325_s16  ;;  %s1204_s9 = sld [smem:[#allocation9]] }
  0x46   : > { %v327_v3 = vmul.f32 %v326_v2, %v322_v0  ;;  %v329_v4 = vstv %s706_s17  ;;  %s1206_s22 = sld [smem:[#allocation9 + $0x1]] }
  0x47   : > { %v330_v5 = vmul.f32 %v705_v1, %v329_v4  ;;  %v333_v6 = vstv %s332_s15  ;;  %s711_s27 = sld [smem:[#allocation3 + $0x4]] }
  0x48   : > { %v336_v7 = vstv %s707_s20  ;;  %s714_s29 = sld [smem:[#allocation3 + $0x5]] }
  0x49   : > { %v331_v8 = vadd.f32 %v330_v5, %v327_v3  ;;  %v337_v9 = vmul.f32 %v336_v7, %v322_v0  ;;  %v339_v10 = vstv %s708_s21  ;;  %s712_s30 = sld [smem:[#allocation3 + $0x6]] }
  0x4a   : > { %v340_v11 = vmul.f32 %v705_v1, %v339_v10  ;;  %v343_v13 = vstv %s709_s18  ;;  %s715_s14 = sld [smem:[#allocation3 + $0x7]] }
  0x4b   : > { %v334_v12 = vadd.f32 %v333_v6, %v331_v8  ;;  %v351_v16 = vstv %s1204_s9  ;;  %s713_s0 = sld [smem:[#allocation7 + $0x2]] }
  0x4c   : > { %v341_v14 = vadd.f32 %v340_v11, %v337_v9  ;;  %v356_v18 = vstv %s1206_s22  ;;  %s716_s7 = sld [smem:[#allocation7 + $0x3]] }
  0x4d   : > { %836 = vtanh.f32 %v334_v12  ;;  %v365_v22 = vstv %s711_s27  ;;  %s1220_s13 = sld [smem:[#allocation9 + $0x2]] }
  0x4e   : > { %v344_v15 = vadd.f32 %v343_v13, %v341_v14  ;;  %v375_v23 = vstv %s714_s29  ;;  %s1222_s12 = sld [smem:[#allocation9 + $0x3]] }
  0x4f   : > { %v368_v25 = vstv %s712_s30  ;;  %s719_s19 = sld [smem:[#allocation3 + $0x8]] }
  0x50   : > { %838 = vtanh.f32 %v344_v15  ;;  %v378_v26 = vstv %s715_s14  ;;  %s720_s16 = sld [smem:[#allocation3 + $0xa]] }
  0x51   : > { %v372_v32 = vstv %s713_s0  ;;  %s722_s17 = sld [smem:[#allocation3 + $0x9]] }
  0x52   : > { %v382_v33 = vstv %s716_s7  ;;  %s723_s15 = sld [smem:[#allocation3 + $0xb]] }
  0x53   : > { %v1209_v17 = vpop.eup %836  ;;  %v390_v38 = vstv %s1220_s13  ;;  %s721_s20 = sld [smem:[#allocation7 + $0x4]] }
  0x54   : > { %v360_v19 = vmul.f32 %v1209_v17, %v351_v16  ;;  %v395_v39 = vstv %s1222_s12  ;;  %s724_s21 = sld [smem:[#allocation7 + $0x5]]  ;;  %v349_v63 = vmul.f32 %v1209_v17, %v1209_v17  ;;  %s744_s12 = sshll.u32 %s1105_s3, 3 }
  0x55   : > { %v404_v44 = vstv %s719_s19  ;;  %s1230_s18 = sld [smem:[#allocation9 + $0x4]] }
  0x56   : > { %v1215_v20 = vpop.eup %838  ;;  %v361_v21 = vadd.f32 %v360_v19, %v334_v12  ;;  %v407_v47 = vstv %s720_s16  ;;  %s1232_s27 = sld [smem:[#allocation9 + $0x5]]  ;;  %v350_v12 = vsub.f32 1.0, %v349_v63 }
  0x57   : > { %v362_v24 = vmul.f32 %v1215_v20, %v356_v18  ;;  %v414_v45 = vstv %s722_s17  ;;  %s727_s29 = sld [smem:[#allocation3 + $0xc]]  ;;  %v354_v0 = vmul.f32 %v1215_v20, %v1215_v20 }
  0x58   : > { %v366_v28 = vmul.f32 %v365_v22, %v361_v21  ;;  %v376_v29 = vmul.f32 %v375_v23, %v361_v21  ;;  %v417_v48 = vstv %s723_s15  ;;  %s728_s30 = sld [smem:[#allocation3 + $0xe]] }
  0x59   : > { %v363_v27 = vadd.f32 %v362_v24, %v344_v15  ;;  %v411_v54 = vstv %s721_s20  ;;  %s730_s14 = sld [smem:[#allocation3 + $0xd]]  ;;  %v355_v13 = vsub.f32 1.0, %v354_v0 }
  0x5a   : > { %v421_v55 = vstv %s724_s21  ;;  %s731_s0 = sld [smem:[#allocation3 + $0xf]] }
  0x5b   : > { %v369_v30 = vmul.f32 %v368_v25, %v363_v27  ;;  %v379_v31 = vmul.f32 %v378_v26, %v363_v27  ;;  %v430_v60 = vstv %s1230_s18  ;;  %s1235_s7 = sld [smem:[#allocation7 + $0x6]] }
  0x5c   : > { %v435_v61 = vstv %s1232_s27  ;;  %s1238_s19 = sld [smem:[#allocation7 + $0x7]] }
  0x5d   : > { %v370_v34 = vadd.f32 %v369_v30, %v366_v28  ;;  %v380_v35 = vadd.f32 %v379_v31, %v376_v29  ;;  %v444_v6 = vstv %s727_s29  ;;  %s1246_s16 = sld [smem:[#allocation9 + $0x6]]  ;;  %v352_v28 = vmul.f32 %v351_v16, %v350_v12  ;;  %s535_s29 = scalar_lea.hbm %s1346_s5, %s744_s12 }
  0x5e   : > { %v447_v9 = vstv %s728_s30  ;;  %s1248_s17 = sld [smem:[#allocation9 + $0x7]]  ;;  %v357_v29 = vmul.f32 %v356_v18, %v355_v13  ;;  %s314_s30 = scalar_lea.vmem [#allocation11], %s702_s1 }
  0x5f   : > { %v373_v36 = vadd.f32 %v372_v32, %v370_v34  ;;  %v383_v37 = vadd.f32 %v382_v33, %v380_v35  ;;  %v454_v7 = vstv %s730_s14  ;;  %s1258_s15 = sld [smem:[#allocation3 + $0x10]]  ;;  %v353_v16 = vadd.f32 1.0, %v352_v28  ;;  %s536_s14 = sshll.u32 %s314_s30, 4  ;;  %s1288_s14 = int_to_ptr.vmem [resolvable:$true] %s536_s14 }
  0x60   : > { %v457_v10 = vstv %s731_s0  ;;  %s1260_s20 = sld [smem:[#allocation3 + $0x12]]  ;;  %v358_v18 = vadd.f32 1.0, %v357_v29  ;;  %s538_s0 = sshll.u32 %s535_s29, 4  ;;  %s1290_s0 = int_to_ptr.hbm [resolvable:$true] %s538_s0 }
  0x61   : > { %840 = vtanh.f32 %v373_v36  ;;  %v451_v24 = vstv %s1235_s7  ;;  %s1262_s21 = sld [smem:[#allocation3 + $0x11]]  ;;  %s704_s1 = sshll.u32 %s1194_s8, 3 }
  0x62   : > { %842 = vtanh.f32 %v383_v37  ;;  %v461_v25 = vstv %s1238_s19  ;;  %s1264_s9 = sld [smem:[#allocation3 + $0x13]]  ;;  %s520_s19 = scalar_lea.sflag [#allocation5], %s1194_s8 }
  0x63   : > { %s1267_s22 = sld [smem:[#allocation7 + $0x8]] }
  0x64   : > { %s1270_s13 = sld [smem:[#allocation7 + $0x9]] }
  0x65   : > { %s1286_s7 = sld [smem:[#allocation2]] }
  0x67   : > { %v841_v40 = vpop.eup %840 }
  0x68   : > { %v843_v41 = vpop.eup %842  ;;  %v399_v42 = vmul.f32 %v841_v40, %v390_v38  ;;  %v388_v3 = vmul.f32 %v841_v40, %v841_v40  ;;  %v470_v40 = vstv %s1246_s16  ;;  %s943_s16 = sshra.s32 %s1290_s0, 4  ;;  %s944_s16 = int_to_ptr.hbm [resolvable:$true] %s943_s16 }
  0x69   : > { %v401_v43 = vmul.f32 %v843_v41, %v395_v39  ;;  %v393_v4 = vmul.f32 %v843_v41, %v843_v41  ;;  %v475_v41 = vstv %s1248_s17  ;;  %s945_s17 = scalar_lea.hbm %s944_s16, 16  ;;  %p950_p3 = scmp.lt.s32.totalorder %s944_s16, %s1346_s5 }
  0x6a   : > { %v400_v46 = vadd.f32 %v399_v42, %v373_v36  ;;  %v389_v17 = vsub.f32 1.0, %v388_v3  ;;  %p946_p4 = scmp.ne.s32.totalorder %s944_s16, %s945_s17 }
  0x6b   : > { %v402_v49 = vadd.f32 %v401_v43, %v383_v37  ;;  %v394_v19 = vsub.f32 1.0, %v393_v4  ;;  %v359_v43 = vmul.f32 %v358_v18, %v353_v16  ;;  %v491_v4 = vstv %s1267_s22 }
  0x6c   : > { %v405_v50 = vmul.f32 %v404_v44, %v400_v46  ;;  %v415_v51 = vmul.f32 %v414_v45, %v400_v46  ;;  %v391_v30 = vmul.f32 %v390_v38, %v389_v17  ;;  %p947_p6 = pnand %p946_p4, %p1136_p11 }
  0x6d   : > { %v408_v52 = vmul.f32 %v407_v47, %v402_v49  ;;  %v418_v53 = vmul.f32 %v417_v48, %v402_v49  ;;  %v396_v31 = vmul.f32 %v395_v39, %v394_v19 }
  0x6e   : > { %v392_v36 = vadd.f32 1.0, %v391_v30  ;;  %p948_p13 = pneg %p947_p6 }
  0x6f   : > { %v409_v56 = vadd.f32 %v408_v52, %v405_v50  ;;  %v419_v57 = vadd.f32 %v418_v53, %v415_v51  ;;  %v397_v37 = vadd.f32 1.0, %v396_v31  ;;  %v484_v51 = vstv %s1258_s15 }
  0x70   : > { %v494_v52 = vstv %s1262_s21  ;;  %s949_s21 = scalar_lea.hbm %s1346_s5, 48 }
  0x71   : > { %v412_v58 = vadd.f32 %v411_v54, %v409_v56  ;;  %v422_v59 = vadd.f32 %v421_v55, %v419_v57  ;;  %v398_v44 = vmul.f32 %v397_v37, %v392_v36  ;;  %v487_v55 = vstv %s1260_s20  ;;  %p951_p5 = scmp.lt.s32.totalorder %s949_s21, %s945_s17 }
  0x72   : > { %v497_v56 = vstv %s1264_s9 }
  0x73   : > { %844 = vtanh.f32 %v412_v58  ;;  %p952_p7 = por %p951_p5, %p950_p3 }
  0x74   : > { %846 = vtanh.f32 %v422_v59 }
  0x75   : > { %p953_p8 = pnand %p952_p7, %p948_p13 }
  0x79   : > { %v845_v62 = vpop.eup %844 }
  0x7a   : > { %v847_v1 = vpop.eup %846  ;;  %v439_v2 = vmul.f32 %v845_v62, %v430_v60  ;;  %v428_v22 = vmul.f32 %v845_v62, %v845_v62 }
  0x7b   : > { %v441_v5 = vmul.f32 %v847_v1, %v435_v61  ;;  %v433_v23 = vmul.f32 %v847_v1, %v847_v1 }
  0x7c   : > { %v440_v8 = vadd.f32 %v439_v2, %v412_v58  ;;  %v429_v34 = vsub.f32 1.0, %v428_v22 }
  0x7d   : > { %v442_v11 = vadd.f32 %v441_v5, %v422_v59  ;;  %v434_v35 = vsub.f32 1.0, %v433_v23  ;;  %v423_v59 = vmul.f32 %v398_v44, %v359_v43  ;;  %v501_v5 = vstv %s1270_s13 }
  0x7e   : > { %v445_v14 = vmul.f32 %v444_v6, %v440_v8  ;;  %v455_v15 = vmul.f32 %v454_v7, %v440_v8  ;;  %v431_v38 = vmul.f32 %v430_v60, %v429_v34 }
  0x7f   : > { %v448_v20 = vmul.f32 %v447_v9, %v442_v11  ;;  %v458_v21 = vmul.f32 %v457_v10, %v442_v11  ;;  %v436_v39 = vmul.f32 %v435_v61, %v434_v35 }
  0x80   : > { %v432_v45 = vadd.f32 1.0, %v431_v38 }
  0x81   : > { %v449_v26 = vadd.f32 %v448_v20, %v445_v14  ;;  %v459_v27 = vadd.f32 %v458_v21, %v455_v15  ;;  %v437_v46 = vadd.f32 1.0, %v436_v39 }
  0x83   : > { %v452_v32 = vadd.f32 %v451_v24, %v449_v26  ;;  %v462_v33 = vadd.f32 %v461_v25, %v459_v27  ;;  %v438_v60 = vmul.f32 %v437_v46, %v432_v45 }
  0x85   : > { %848 = vtanh.f32 %v452_v32  ;;  %v463_v9 = vmul.f32 %v438_v60, %v423_v59 }
  0x86   : > { %850 = vtanh.f32 %v462_v33 }
  0x8b   : > { %v849_v42 = vpop.eup %848 }
  0x8c   : > { %v851_v47 = vpop.eup %850  ;;  %v479_v48 = vmul.f32 %v849_v42, %v470_v40  ;;  %v468_v49 = vmul.f32 %v849_v42, %v849_v42 }
  0x8d   : > { %v481_v50 = vmul.f32 %v851_v47, %v475_v41  ;;  %v473_v53 = vmul.f32 %v851_v47, %v851_v47 }
  0x8e   : > { %v480_v54 = vadd.f32 %v479_v48, %v452_v32  ;;  %v469_v57 = vsub.f32 1.0, %v468_v49 }
  0x8f   : > { %v482_v58 = vadd.f32 %v481_v50, %v462_v33  ;;  %v474_v61 = vsub.f32 1.0, %v473_v53 }
  0x90   : > { %v485_v62 = vmul.f32 %v484_v51, %v480_v54  ;;  %v495_v63 = vmul.f32 %v494_v52, %v480_v54  ;;  %v471_v0 = vmul.f32 %v470_v40, %v469_v57 }
  0x91   : > { %v488_v1 = vmul.f32 %v487_v55, %v482_v58  ;;  %v498_v2 = vmul.f32 %v497_v56, %v482_v58  ;;  %v476_v3 = vmul.f32 %v475_v41, %v474_v61 }
  0x92   : > { %v472_v6 = vadd.f32 1.0, %v471_v0 }
  0x93   : > { %v489_v7 = vadd.f32 %v488_v1, %v485_v62  ;;  %v499_v8 = vadd.f32 %v498_v2, %v495_v63  ;;  %v477_v10 = vadd.f32 1.0, %v476_v3 }
  0x95   : > { %v492_v11 = vadd.f32 %v491_v4, %v489_v7  ;;  %v502_v12 = vadd.f32 %v501_v5, %v499_v8  ;;  %v478_v13 = vmul.f32 %v477_v10, %v472_v6 }
  0x97   : > { %507 = vst [vmem:[%s314_s30] sm:$0xff] %v492_v11  ;;  %v511_v14 = vmul.f32 %v492_v11, %v492_v11  ;;  %v512_v15 = vmul.f32 %v502_v12, %v502_v12  ;;  %v503_v17 = vmul.f32 %v478_v13, %v463_v9 }
  0x98   : > { %741 = vst [vmem:[%s314_s30 + $0x8] sm:$0xff] %v502_v12 }
  0x99   : > { %v513_v19 = vadd.f32 %v512_v15, %v511_v14  ;;  %852 = vlog2.f32 %v503_v17 }
  0x9a   : > { %956 = shalt.err (!%p953_p8)
}
  0x9b   : > { %s1043_s13 = smov 128   ;;  %s1044_s18 = smov 384   ;;  %v514_v20 = vmul.f32 0.5, %v513_v19  ;;  %v515_v21 = vstv %s1286_s7 }
  0x9c   : > { %s1045_s27 = smov 8   ;;  %s551_s16 = scalar_lea.hbm %s1347_s6, %s744_s12 }
  0x9d   : > { %762 = dma.vmem_to_hbm [thread:$0]  (%p1136_p11), %s1288_s14, 256, %s1290_s0, %s520_s19, %s1043_s13, %s1044_s18, %s1045_s27   ;;  %v516_v22 = vsub.f32 %v515_v21, %v514_v20 }
  0x9e   : > { %s321_s17 = scalar_lea.vmem [#allocation12], %s704_s1  ;;  %s555_s20 = sshll.u32 %s551_s16, 4  ;;  %s556_s20 = int_to_ptr.hbm [resolvable:$true] %s555_s20 }
  0x9f   : > { %s553_s15 = sshll.u32 %s321_s17, 4  ;;  %v853_v23 = vpop.eup %852  ;;  %s525_s21 = scalar_lea.sflag [#allocation13], %s1194_s8  ;;  %s554_s15 = int_to_ptr.vmem [resolvable:$true] %s553_s15 }
  0xa0   : > { %v505_v24 = vmul.f32 0.6931472, %v853_v23  ;;  %s971_s14 = sshra.s32 %s556_s20, 4  ;;  %s977_s7 = scalar_lea.hbm %s1347_s6, 24  ;;  %s972_s14 = int_to_ptr.hbm [resolvable:$true] %s971_s14 }
  0xa1   : > { %s973_s0 = scalar_lea.hbm %s972_s14, 8  ;;  %p978_p0 = scmp.lt.s32.totalorder %s972_s14, %s1347_s6 }
  0xa2   : > { %v517_v25 = vadd.f32 %v516_v22, %v505_v24  ;;  %p974_p9 = scmp.ne.s32.totalorder %s972_s14, %s973_s0  ;;  %p979_p2 = scmp.lt.s32.totalorder %s977_s7, %s973_s0 }
  0xa4   : > { %518 = vst [vmem:[%s321_s17] sm:$0xff] %v517_v25  ;;  %p975_p10 = pnand %p974_p9, %p1136_p11  ;;  %p980_p4 = por %p979_p2, %p978_p0 }
  0xa6   : > { %p976_p1 = pneg %p975_p10 }
  0xa8   : > { %p981_p6 = pnand %p980_p4, %p976_p1 }
  0xaa   : > { %984 = shalt.err (!%p981_p6)
}
  0xab   : > { %763 = dma.vmem_to_hbm [thread:$0]  (%p1136_p11), %s554_s15, 128, %s556_s20, %s525_s21  }
  0xac PF: > { %p794_p13 = scmp.ge.s32.totalorder %s1035_s26, 2  ;;  %s567_s8 = sand.u32 1, %s1023_s23  }
  0xad   : > { %s568_s9 = scalar_lea.sflag [#allocation5], %s567_s8 }
  0xae   : > { %p781_p3 = pnand %p794_p13, %p1140_p12 }
  0xb0   : > { %p782_p5 = pneg %p781_p3 }
  0xb2   : > { %1014 = dma.done.wait (%p782_p5), %s568_s9, 256  }
  0xb3   : > { %1016 = vsyncadd (%p782_p5), %s568_s9, 4294967040  ;;  %s578_s22 = scalar_lea.sflag [#allocation13], %s567_s8 }
  0xb4   : > { %1018 = dma.done.wait (%p782_p5), %s578_s22, 128  }
  0xb5   : > { %1020 = vsyncadd (%p782_p5), %s578_s22, 4294967168  ;;  %s1359_s10 = sld [smem:[#allocation19_spill]]  ;;  %p26_p11 = scmp.ge.s32.totalorder %s1109_s28, 5  }
  0xb6   : > { %s1360_s23 = smov %s1027_s24  ;;  %s1361_s24 = smov %s1031_s25 }
  0xb7   : > { %s1363_s26 = smov %s1109_s28  ;;  %28 = sbr.rel (!%p26_p11) target bundleno = 13 (0xd), region = 117 }
  0xbb   : > { %s1362_s25 = smov %s1359_s10 }
  0xbc   :  { %584 = vsyncpa [#allocation4], 1 }
  0xbd   :  { %586 = vsyncpa [#allocation4 + $0x1], 1 }
  0xbe   :  { %587 = vsyncpa [#allocation5], 1 }
  0xbf   :  { %589 = vsyncpa [#allocation5 + $0x1], 1 }
  0xc0   :  { %590 = vsyncpa [#allocation13], 1 }
  0xc1   :  { %592 = vsyncpa [#allocation13 + $0x1], 1 }
  0xc2   :  { %593 = vsyncpa [#allocation6], 1 }
  0xc3   :  { %595 = vsyncpa [#allocation6 + $0x1], 1 }
  0xc4   :  { %596 = vsyncpa [#allocation8], 1 }

</bundles_post_ra>
